<compile_context>
chip_gen: v5e
topology: v5e:2x2
jax: 0.10.0
libtpu: 0.0.40
codegen_flags: <defaults>
</compile_context>

<pallas_src>
import jax
import jax.numpy as jnp
from jax.experimental import pallas as pl
from jax.experimental.pallas import tpu as pltpu


def _requ_kernel(x_ref, o_ref):
    x = x_ref[...]
    r = jnp.maximum(x, 0)                       # ReLU (VPU)
    o_ref[...] = (0.5 * r * r).astype(o_ref.dtype)


def _cdiv(a, b):
    return -(-a // b)


def _vmem_budget_bytes():
    """~Half of physical VMEM (generation-aware), capped at 64 MiB."""
    vmem = 128 * 1024 * 1024
    try:
        info = pltpu.get_tpu_info()
        vmem = int(getattr(info, "vmem_capacity_bytes", vmem)) or vmem
    except Exception:
        pass
    return min(vmem // 2, 64 * 1024 * 1024)


def _pick_layout(n, itemsize, max_block_bytes):
    """Choose (lane_width, rows, tile_rows, pad_elems) for a flat array of n elems."""
    # Native sublane tiling: (8,128) f32, (16,128) bf16, (32,128) int8/fp8.
    sub = {1: 32, 2: 16}.get(itemsize, 8)

    # 1) Widest lane dim (multiple of 128) that still leaves >= `sub` rows, so
    #    vregs are full (unmasked vst) and DMA descriptors stay large.
    lane_w = 0
    for w in (4096, 2048, 1024, 512, 256, 128):
        if n % w == 0 and n // w >= sub:
            lane_w = w
            break
    pad = 0
    if lane_w == 0:
        lane_w = 128
        pad = (-n) % 128            # only when n is not 128-aligned or tiny
    total = n + pad
    rows = total // lane_w

    # 2) Rows per block: multiple of `sub`, block <= max_block_bytes, and at
    #    least 2 grid steps for anything non-tiny (megacore on v7x).
    row_bytes = lane_w * itemsize
    max_rows = max(sub, (max_block_bytes // row_bytes) // sub * sub)
    if rows < 2 * sub:
        tile_rows = rows                        # full-extent block (always legal)
    else:
        n_blocks = max(2, _cdiv(rows, max_rows))
        tile_rows = min(max_rows, _cdiv(_cdiv(rows, n_blocks), sub) * sub)
    return lane_w, rows, tile_rows, pad


def requ(x, *, max_block_bytes=None):
    """Elementwise 0.5 * relu(x)**2 computed in a Pallas TPU kernel."""
    orig_shape = x.shape
    orig_dtype = x.dtype

    flat = x.reshape(-1)
    n = flat.shape[0]
    itemsize = jnp.dtype(orig_dtype).itemsize

    # Generation-aware VMEM budget: in + out, each double-buffered => 4 x block.
    budget = _vmem_budget_bytes()
    if max_block_bytes is None:
        max_block_bytes = min(budget // 4, 8 * 1024 * 1024)

    lane_w, rows, tile_rows, pad = _pick_layout(n, itemsize, max_block_bytes)
    if pad:
        # Rare fallback (n not a multiple of 128): zero-pad the ragged tail.
        # 0.5*relu(0)^2 == 0 so padded values are harmless; sliced off below.
        # TODO(synk): replace with in-kernel tail masking to avoid the extra
        # full-array pad/slice HBM copies for non-lane-aligned sizes.
        flat = jnp.pad(flat, (0, pad))
    x2d = flat.reshape(rows, lane_w)

    grid = (_cdiv(rows, tile_rows),)            # partial last block masked by Pallas
    out2d = pl.pallas_call(
        _requ_kernel,
        out_shape=jax.ShapeDtypeStruct((rows, lane_w), orig_dtype),
        grid_spec=pltpu.PrefetchScalarGridSpec(
            num_scalar_prefetch=0,
            grid=grid,
            in_specs=[pl.BlockSpec((tile_rows, lane_w), lambda i: (i, 0))],
            out_specs=pl.BlockSpec((tile_rows, lane_w), lambda i: (i, 0)),
        ),
        compiler_params=pltpu.CompilerParams(
            dimension_semantics=("parallel",),
            vmem_limit_bytes=budget,
        ),
        cost_estimate=pl.CostEstimate(
            flops=3 * rows * lane_w,
            transcendentals=0,
            bytes_accessed=2 * rows * lane_w * itemsize,
        ),
    )(x2d)

    if pad:
        return out2d.reshape(-1)[:n].reshape(orig_shape)
    return out2d.reshape(orig_shape)


if __name__ == "__main__":
    key = jax.random.PRNGKey(0)
    # Small NCHW input consistent with typical conv-net activations.
    x = jax.random.normal(key, (2, 4, 16, 16), dtype=jnp.float32) * 5.0

    out = requ(x)
    out = jax.block_until_ready(out)

    # Reference: 0.5 * relu(x)^2
    ref = 0.5 * jnp.square(jnp.maximum(x, 0.0))
    assert out.shape == x.shape and out.dtype == x.dtype
    assert jnp.max(jnp.abs(out - ref)) < 1e-5

    print("KERNEL_OK")
</pallas_src>

<mosaic_0001>
module attributes {stable_mosaic.version = 11 : i64} {
  func.func @_requ_kernel(%arg0: i32, %arg1: memref<8x256xf32, #tpu.memory_space<vmem>>, %arg2: memref<8x256xf32, #tpu.memory_space<vmem>>) attributes {dimension_semantics = [#tpu.dimension_semantics<parallel>], iteration_bounds = array<i64: 1>, scalar_prefetch = 0 : i64, scratch_operands = 0 : i64, tpu.core_type = #tpu.core_type<tc>, window_params = [{transform_indices = @transform_0, window_bounds = array<i64: 8, 256>}, {transform_indices = @transform_1, window_bounds = array<i64: 8, 256>}]} {
    %c0 = arith.constant 0 : index
    %c0_0 = arith.constant 0 : index
    %0 = vector.load %arg1[%c0, %c0_0] : memref<8x256xf32, #tpu.memory_space<vmem>>, vector<8x256xf32>
    %cst = arith.constant 0.000000e+00 : f32
    %1 = vector.broadcast %cst : f32 to vector<8x256xf32>
    %2 = arith.maximumf %0, %1 : vector<8x256xf32>
    %cst_1 = arith.constant 5.000000e-01 : f32
    %3 = vector.broadcast %cst_1 : f32 to vector<8x256xf32>
    %4 = arith.mulf %3, %2 : vector<8x256xf32>
    %5 = arith.mulf %4, %2 : vector<8x256xf32>
    %c0_2 = arith.constant 0 : index
    %c0_3 = arith.constant 0 : index
    %6 = vector.load %arg2[%c0_2, %c0_3] : memref<8x256xf32, #tpu.memory_space<vmem>>, vector<8x256xf32>
    tpu.vector_store %arg2[%c0_2, %c0_3], %5 {strides = array<i32>} : memref<8x256xf32, #tpu.memory_space<vmem>>, vector<8x256xf32>,
    return
  }
  func.func @transform_0(%arg0: i32) -> (i32, i32) {
    %c0_i32 = arith.constant 0 : i32
    %c0_i32_0 = arith.constant 0 : i32
    return %arg0, %c0_i32 : i32, i32
  }
  func.func @transform_1(%arg0: i32) -> (i32, i32) {
    %c0_i32 = arith.constant 0 : i32
    %c0_i32_0 = arith.constant 0 : i32
    return %arg0, %c0_i32 : i32, i32
  }
}

</mosaic_0001>

<bundles_post_ra>
// kernel: tpu_custom_call.1
= control target key start
LH: loop header
LB: loop body
LE: loop exit
PB: predicated region body
PF: predicated region fallthrough
CT: control target
= control target key end

     0   :  { %6 = vsyncpa [#allocation3], 0  ;;  %s122_s0 = inlined_call_operand.hbm [shape: f32[8,256], index: 0, kind: input, shape index: {}]   ;;  %s123_s1 = inlined_call_operand.hbm [shape: f32[8,256], index: 1, kind: output, shape index: {}]  }
   0x1   :  { %7 = vsyncpa [#allocation4], 0  ;;  %s13_s8 = sshll.u32 %s122_s0, 4  ;;  %s104_s9 = smov [#allocation2]   ;;  %s14_s8 = int_to_ptr.hbm [resolvable:$true] %s13_s8 }
   0x2   :  { %s15_s10 = sshll.u32 %s104_s9, 4  ;;  %s16_s10 = int_to_ptr.vmem [resolvable:$true] %s15_s10 }
   0x3   :  { %18 = dma.hbm_to_vmem [thread:$0]  %s14_s8, 256, %s16_s10, [#allocation3]  }
   0x4   :  { %100 = dma.done.wait [#allocation3], 256  }
   0x5   :  { %101 = vsyncadd [#allocation3], 4294967040  ;;  %v23_v0 = vld [vmem:[#allocation2] sm:$0xff]  ;;  %v24_v1 = vld [vmem:[#allocation2 + $0x8] sm:$0xff]  ;;  %s105_s11 = smov [#allocation5]   ;;  %s40_s15 = sshll.u32 %s123_s1, 4  ;;  %s41_s15 = int_to_ptr.hbm [resolvable:$true] %s40_s15 }
   0x6   :  { %v25_v2 = vmax.f32 %v23_v0, 0.0  ;;  %v26_v3 = vmax.f32 %v24_v1, 0.0  ;;  %s38_s12 = sshll.u32 %s105_s11, 4  ;;  %s39_s12 = int_to_ptr.vmem [resolvable:$true] %s38_s12 }
   0x8   :  { %v27_v4 = vmul.f32 0.5, %v25_v2  ;;  %v28_v5 = vmul.f32 0.5, %v26_v3 }
   0xa   :  { %v29_v6 = vmul.f32 %v27_v4, %v25_v2  ;;  %v30_v7 = vmul.f32 %v28_v5, %v26_v3 }
   0xc   :  { %31 = vst [vmem:[#allocation5] sm:$0xff] %v29_v6 }
   0xd   :  { %32 = vst [vmem:[#allocation5 + $0x8] sm:$0xff] %v30_v7 }
   0xe   :  { %43 = dma.vmem_to_hbm [thread:$0]  %s39_s12, 256, %s41_s15, [#allocation4]  }
   0xf   :  { %102 = dma.done.wait [#allocation4], 256  }
  0x10   :  { %103 = vsyncadd [#allocation4], 4294967040 }
  0x11   :  { %48 = vsyncpa [#allocation3], 1 }
  0x12   :  { %49 = vsyncpa [#allocation4], 1 }

</bundles_post_ra>
